<compile_context>
chip_gen: v5e
topology: v5e:2x2
jax: 0.10.0
libtpu: 0.0.40
codegen_flags: <defaults>
</compile_context>

<pallas_src>
import functools

import jax
import jax.numpy as jnp
from jax import lax
from jax.experimental import pallas as pl
from jax.experimental.pallas import tpu as pltpu


def _round_up(x, m):
    return ((x + m - 1) // m) * m


def _cdiv(a, b):
    return (a + b - 1) // b


# ----------------------------- Pallas kernels --------------------------------
def _conv_mm_kernel(p_ref, w_ref, b_ref, o_ref, acc_ref, *, act):
    """Tiled im2col-matmul + bias + activation.

    Grid: (M/tm, Cout/tn, K/tk), K last ('arbitrary' reduction axis).
    p_ref:   (tm, tk)  bf16 patch tile
    w_ref:   (tk, tn)  bf16 transposed conv-weight tile
    b_ref:   (1,  tn)  f32 bias tile
    o_ref:   (tm, tn)  output tile (bf16 hidden layers, f32 final layer)
    acc_ref: (tm, tn)  f32 accumulator scratch, resident across the K sweep
    """
    k = pl.program_id(2)

    @pl.when(k == 0)
    def _():
        acc_ref[...] = jnp.zeros_like(acc_ref)

    # Pure MXU push every K step; epilogue only on the last step.
    acc_ref[...] += jnp.dot(p_ref[...], w_ref[...],
                            preferred_element_type=jnp.float32)

    @pl.when(k == pl.num_programs(2) - 1)
    def _():
        acc = acc_ref[...] + b_ref[...]            # f32 epilogue (v5e-safe)
        if act == "leaky_relu":
            acc = jnp.where(acc >= 0.0, acc, 0.2 * acc)
        elif act == "sigmoid":
            # numerically stable sigmoid: exp on EUP + approx reciprocal
            e = jnp.exp(-jnp.abs(acc))
            inv = pl.reciprocal(1.0 + e, approx=True)
            acc = jnp.where(acc >= 0.0, inv, e * inv)
        o_ref[...] = acc.astype(o_ref.dtype)


def _conv_mv_kernel(p_ref, w_ref, b_ref, o_ref, acc_ref, *, act):
    """Cout == 1 path: per-lane VPU partial products, one lane-reduce epilogue.

    Grid: (M/tm, K/tk), K last.
    p_ref:   (tm, tk)  bf16 patch tile
    w_ref:   (1,  tk)  f32 weight row
    b_ref:   (1,  1)   f32 bias
    o_ref:   (tm, 1)   f32 output column
    acc_ref: (tm, tk)  f32 per-lane partial sums
    """
    k = pl.program_id(1)

    @pl.when(k == 0)
    def _():
        acc_ref[...] = jnp.zeros_like(acc_ref)

    # bf16 * f32 -> f32 on the VPU; keep the XLU reduce out of the K loop.
    acc_ref[...] += p_ref[...] * w_ref[...]

    @pl.when(k == pl.num_programs(1) - 1)
    def _():
        s = jnp.sum(acc_ref[...], axis=1, keepdims=True) + b_ref[...]
        if act == "leaky_relu":
            s = jnp.where(s >= 0.0, s, 0.2 * s)
        elif act == "sigmoid":
            e = jnp.exp(-jnp.abs(s))
            inv = pl.reciprocal(1.0 + e, approx=True)
            s = jnp.where(s >= 0.0, inv, e * inv)
        o_ref[...] = s.astype(o_ref.dtype)


# ------------------------------ tile planning --------------------------------
_VMEM_LIMIT = 48 * 1024 * 1024   # fits v7x's 64 MiB VMEM with headroom


def _tiles(M, K, Cout):
    # >=2 blocks on the 'parallel' M axis whenever possible so both v7x TCs
    # get work; cap at 512 rows.
    tm = min(512, _round_up(_cdiv(M, 2), 16))
    M_p = _round_up(M, tm)
    # K tiled at 1024 (halves K grid steps / accumulator RMW vs 512).
    K_128 = _round_up(K, 128)
    tk = min(1024, K_128)
    K_p = _round_up(K_128, tk)
    # tn covers the whole (padded) Cout for this net -> single HBM pass over
    # the patch matrix.
    C_128 = _round_up(Cout, 128)
    tn = min(512, C_128)
    C_p = _round_up(C_128, tn)
    return tm, tk, tn, M_p, K_p, C_p


# ------------------------------ kernel wrappers -------------------------------
def _pallas_conv_mm(patches, w_t, bias, act, out_dtype):
    """patches: (M, K) bf16; w_t: (K, Cout) bf16; bias: (1, Cout) f32."""
    M, K = patches.shape
    Cout = w_t.shape[1]
    tm, tk, tn, M_p, K_p, C_p = _tiles(M, K, Cout)

    # Single-pass zero-pad to tile multiples (zeros multiply out; padded
    # rows/cols are sliced off afterwards).
    p = jnp.pad(patches, ((0, M_p - M), (0, K_p - K)))
    w = jnp.pad(w_t, ((0, K_p - K), (0, C_p - Cout)))
    b = jnp.pad(bias, ((0, 0), (0, C_p - Cout)))

    grid = (M_p // tm, C_p // tn, K_p // tk)

    cost = pl.CostEstimate(
        flops=2 * M_p * K_p * C_p,
        transcendentals=M_p * C_p if act == "sigmoid" else 0,
        bytes_accessed=(p.size * 2 + w.size * 2 + b.size * 4
                        + M_p * C_p * jnp.dtype(out_dtype).itemsize),
    )

    out = pl.pallas_call(
        functools.partial(_conv_mm_kernel, act=act),
        out_shape=jax.ShapeDtypeStruct((M_p, C_p), out_dtype),
        grid_spec=pltpu.PrefetchScalarGridSpec(
            num_scalar_prefetch=0,
            grid=grid,
            in_specs=[
                pl.BlockSpec((tm, tk), lambda i, j, k: (i, k)),
                pl.BlockSpec((tk, tn), lambda i, j, k: (k, j)),
                pl.BlockSpec((1, tn), lambda i, j, k: (0, j)),
            ],
            out_specs=pl.BlockSpec((tm, tn), lambda i, j, k: (i, j)),
            scratch_shapes=[pltpu.VMEM((tm, tn), jnp.float32)],
        ),
        compiler_params=pltpu.CompilerParams(
            dimension_semantics=("parallel", "parallel", "arbitrary"),
            vmem_limit_bytes=_VMEM_LIMIT,
        ),
        cost_estimate=cost,
    )(p, w, b)
    return out[:M, :Cout]


def _pallas_conv_mv(patches, w_col, bias, act):
    """Cout == 1 conv as a matvec; patches: (M, K) bf16, w_col: (K,) f32."""
    M, K = patches.shape
    tm, tk, _, M_p, K_p, _ = _tiles(M, K, 1)

    p = jnp.pad(patches, ((0, M_p - M), (0, K_p - K)))
    w = jnp.pad(w_col.reshape(1, K).astype(jnp.float32), ((0, 0), (0, K_p - K)))
    b = bias.reshape(1, 1).astype(jnp.float32)

    grid = (M_p // tm, K_p // tk)

    cost = pl.CostEstimate(
        flops=2 * M_p * K_p,
        transcendentals=M_p if act == "sigmoid" else 0,
        bytes_accessed=p.size * 2 + w.size * 4 + b.size * 4 + M_p * 4,
    )

    out = pl.pallas_call(
        functools.partial(_conv_mv_kernel, act=act),
        out_shape=jax.ShapeDtypeStruct((M_p, 1), jnp.float32),
        grid_spec=pltpu.PrefetchScalarGridSpec(
            num_scalar_prefetch=0,
            grid=grid,
            in_specs=[
                pl.BlockSpec((tm, tk), lambda i, k: (i, k)),
                pl.BlockSpec((1, tk), lambda i, k: (0, k)),
                pl.BlockSpec((1, 1), lambda i, k: (0, 0)),
            ],
            out_specs=pl.BlockSpec((tm, 1), lambda i, k: (i, 0)),
            scratch_shapes=[pltpu.VMEM((tm, tk), jnp.float32)],
        ),
        compiler_params=pltpu.CompilerParams(
            dimension_semantics=("parallel", "arbitrary"),
            vmem_limit_bytes=_VMEM_LIMIT,
        ),
        cost_estimate=cost,
    )(p, w, b)
    return out[:M, :]


# ------------------------------ JAX glue -------------------------------------
def _extract_patches(x_nhwc, k, stride, pad):
    """NHWC -> ((N*Ho*Wo, k*k*C) patches, (N, Ho, Wo)).

    Feature ordering of the patch axis is (c, ki, kj) with c slowest, which
    matches PyTorch's (Cout, Cin*kh*kw) weight flattening.
    """
    N, H, W, C = x_nhwc.shape
    Ho = (H + 2 * pad - k) // stride + 1
    Wo = (W + 2 * pad - k) // stride + 1
    p = lax.conv_general_dilated_patches(
        x_nhwc,
        filter_shape=(k, k),
        window_strides=(stride, stride),
        padding=((pad, pad), (pad, pad)),
        dimension_numbers=("NHWC", "HWIO", "NHWC"),
    )
    return p.reshape(N * Ho * Wo, k * k * C), (N, Ho, Wo)


def _spectral_normalize(w, u, eps=1e-12):
    """One power iteration (PyTorch spectral_norm default) on (Cout,Cin,kh,kw)."""
    cout = w.shape[0]
    wm = w.reshape(cout, -1)
    v = wm.T @ u
    v = v / (jnp.linalg.norm(v) + eps)
    u_new = wm @ v
    u_new = u_new / (jnp.linalg.norm(u_new) + eps)
    sigma = u_new @ (wm @ v)
    return w / sigma


def _conv_layer(x_nhwc, w, b, stride, act, out_dtype):
    """w: (Cout, Cin, kh, kw) PyTorch layout; x: NHWC bf16. Returns NHWC."""
    cout, cin, kh, kw = w.shape
    # TODO(synk): fully fuse patch extraction into the Pallas kernel (tap-
    # decomposed K axis with shifted-window DMAs of the padded NHWC activation)
    # to remove the materialized kh*kw-expanded patch matrix from HBM; until
    # then it is built in one bf16 XLA pass and read exactly once (tn = Cout).
    patches, (N, Ho, Wo) = _extract_patches(x_nhwc, kh, stride, pad=1)
    if cout == 1:
        # v5e-friendly matvec path: no 128-wide zero-padded MXU columns.
        out = _pallas_conv_mv(patches, w.reshape(-1), b, act)
    else:
        # cast once to bf16 before the transpose/reshape (hoisted weight cast)
        w_t = w.astype(jnp.bfloat16).reshape(cout, -1).T
        out = _pallas_conv_mm(
            patches, w_t, b.reshape(1, cout).astype(jnp.float32), act, out_dtype)
    return out.reshape(N, Ho, Wo, cout)


# ----------------------- Discriminator construction ---------------------------
def make_params(key, input_nc, ndf=64, n_layers=3):
    """Deterministic parameter init. Returns list of layer dicts."""
    layers = []
    chans = [(input_nc, ndf, 2)]
    nf_mult = 1
    for n in range(1, n_layers):
        nf_prev, nf_mult = nf_mult, min(2 ** n, 8)
        chans.append((ndf * nf_prev, ndf * nf_mult, 2))
    nf_prev, nf_mult = nf_mult, min(2 ** n_layers, 8)
    chans.append((ndf * nf_prev, ndf * nf_mult, 1))

    for (cin, cout, stride) in chans:
        key, kw_, kb_, ku_ = jax.random.split(key, 4)
        w = 0.05 * jax.random.normal(kw_, (cout, cin, 4, 4), jnp.float32)
        b = 0.05 * jax.random.normal(kb_, (cout,), jnp.float32)
        u = jax.random.normal(ku_, (cout,), jnp.float32)
        layers.append(dict(w=w, b=b, u=u, stride=stride, spectral=True,
                           act="leaky_relu"))
    # final conv: ndf*nf_mult -> 1, stride 1, no spectral norm, no activation
    key, kw_, kb_ = jax.random.split(key, 3)
    w = 0.05 * jax.random.normal(kw_, (1, ndf * nf_mult, 4, 4), jnp.float32)
    b = 0.05 * jax.random.normal(kb_, (1,), jnp.float32)
    layers.append(dict(w=w, b=b, u=None, stride=1, spectral=False, act="none"))
    return layers


def spectral_norm_discriminator_forward(x_nchw, layers, use_sigmoid=False):
    """Forward pass. x: (N, C, H, W) float32 -> (N, 1, Ho, Wo) float32."""
    # NCHW -> NHWC; hidden activations / MXU operands in bf16, f32 accumulate.
    x = jnp.transpose(x_nchw, (0, 2, 3, 1)).astype(jnp.bfloat16)
    n_layers = len(layers)
    for i, lyr in enumerate(layers):
        w = lyr["w"]
        if lyr["spectral"]:
            w = _spectral_normalize(w, lyr["u"])
        act = lyr["act"]
        last = i == n_layers - 1
        if last and use_sigmoid:
            act = "sigmoid"
        out_dtype = jnp.float32 if last else jnp.bfloat16
        x = _conv_layer(x, w, lyr["b"], lyr["stride"], act, out_dtype)
    return jnp.transpose(x, (0, 3, 1, 2)).astype(jnp.float32)  # NHWC -> NCHW


# --------------------------------- main ---------------------------------------
if __name__ == "__main__":
    key = jax.random.PRNGKey(0)
    k_in, k_par = jax.random.split(key)

    # Small but valid shapes: 32x32 input survives 3 stride-2 convs + two k4/s1
    # convs.
    batch, input_nc, spatial = 2, 3, 32
    ndf, n_layers = 8, 3

    x = jax.random.normal(k_in, (batch, input_nc, spatial, spatial), jnp.float32)
    layers = make_params(k_par, input_nc, ndf=ndf, n_layers=n_layers)

    out = spectral_norm_discriminator_forward(x, layers, use_sigmoid=False)
    out = jax.block_until_ready(out)

    # Expected: 32 ->16 ->8 ->4 -> 3 (s1) -> 2 (s1); output (2, 1, 2, 2)
    assert out.shape == (batch, 1, 2, 2), out.shape
    assert jnp.all(jnp.isfinite(out))
    print("KERNEL_OK")
</pallas_src>

<mosaic_0001>
module attributes {stable_mosaic.version = 11 : i64} {
  func.func @_conv_mm_kernel(%arg0: i32, %arg1: i32, %arg2: i32, %arg3: memref<256x128xbf16, #tpu.memory_space<vmem>>, %arg4: memref<128x128xbf16, #tpu.memory_space<vmem>>, %arg5: memref<1x128xf32, #tpu.memory_space<vmem>>, %arg6: memref<256x128xbf16, #tpu.memory_space<vmem>>, %arg7: memref<256x128xf32, #tpu.memory_space<vmem>>) attributes {dimension_semantics = [#tpu.dimension_semantics<parallel>, #tpu.dimension_semantics<parallel>, #tpu.dimension_semantics<arbitrary>], iteration_bounds = array<i64: 2, 1, 1>, scalar_prefetch = 0 : i64, scratch_operands = 1 : i64, tpu.core_type = #tpu.core_type<tc>, window_params = [{transform_indices = @transform_0, window_bounds = array<i64: 256, 128>}, {transform_indices = @transform_1, window_bounds = array<i64: 128, 128>}, {transform_indices = @transform_2, window_bounds = array<i64: 1, 128>}, {transform_indices = @transform_3, window_bounds = array<i64: 256, 128>}]} {
    %c0_i32 = arith.constant 0 : i32
    %0 = arith.cmpi eq, %arg2, %c0_i32 : i32
    %1 = arith.extui %0 : i1 to i32
    %c0_i32_0 = arith.constant 0 : i32
    %2 = arith.cmpi ne, %1, %c0_i32_0 : i32
    scf.if %2 {
      %cst_10 = arith.constant 0.000000e+00 : f32
      %12 = vector.broadcast %cst_10 : f32 to vector<256x128xf32>
      %c0_11 = arith.constant 0 : index
      %c0_12 = arith.constant 0 : index
      %13 = vector.load %arg7[%c0_11, %c0_12] : memref<256x128xf32, #tpu.memory_space<vmem>>, vector<256x128xf32>
      tpu.vector_store %arg7[%c0_11, %c0_12], %12 {strides = array<i32>} : memref<256x128xf32, #tpu.memory_space<vmem>>, vector<256x128xf32>,
    } else {
    }
    %c0 = arith.constant 0 : index
    %c0_1 = arith.constant 0 : index
    %3 = vector.load %arg7[%c0, %c0_1] : memref<256x128xf32, #tpu.memory_space<vmem>>, vector<256x128xf32>
    %c0_2 = arith.constant 0 : index
    %c0_3 = arith.constant 0 : index
    %4 = vector.load %arg3[%c0_2, %c0_3] : memref<256x128xbf16, #tpu.memory_space<vmem>>, vector<256x128xbf16>
    %c0_4 = arith.constant 0 : index
    %c0_5 = arith.constant 0 : index
    %5 = vector.load %arg4[%c0_4, %c0_5] : memref<128x128xbf16, #tpu.memory_space<vmem>>, vector<128x128xbf16>
    %cst = arith.constant dense<0.000000e+00> : vector<256x128xf32>
    %6 = tpu.matmul %4, %5, %cst {dimension_numbers = #tpu.dot_dimension_numbers<[1], [0], [0], [1], [0, 0, 1, 1], [], []>} : vector<256x128xbf16>, vector<128x128xbf16>, vector<256x128xf32> -> vector<256x128xf32>
    %7 = arith.addf %3, %6 : vector<256x128xf32>
    %c0_6 = arith.constant 0 : index
    %c0_7 = arith.constant 0 : index
    %8 = vector.load %arg7[%c0_6, %c0_7] : memref<256x128xf32, #tpu.memory_space<vmem>>, vector<256x128xf32>
    tpu.vector_store %arg7[%c0_6, %c0_7], %7 {strides = array<i32>} : memref<256x128xf32, #tpu.memory_space<vmem>>, vector<256x128xf32>,
    %c0_i32_8 = arith.constant 0 : i32
    %9 = arith.cmpi eq, %arg2, %c0_i32_8 : i32
    %10 = arith.extui %9 : i1 to i32
    %c0_i32_9 = arith.constant 0 : i32
    %11 = arith.cmpi ne, %10, %c0_i32_9 : i32
    scf.if %11 {
      %c0_10 = arith.constant 0 : index
      %c0_11 = arith.constant 0 : index
      %12 = vector.load %arg7[%c0_10, %c0_11] : memref<256x128xf32, #tpu.memory_space<vmem>>, vector<256x128xf32>
      %c0_12 = arith.constant 0 : index
      %c0_13 = arith.constant 0 : index
      %13 = vector.load %arg5[%c0_12, %c0_13] : memref<1x128xf32, #tpu.memory_space<vmem>>, vector<1x128xf32>
      %14 = vector.broadcast %13 : vector<1x128xf32> to vector<256x128xf32>
      %15 = arith.addf %12, %14 : vector<256x128xf32>
      %cst_14 = arith.constant 0.000000e+00 : f32
      %16 = vector.broadcast %cst_14 : f32 to vector<256x128xf32>
      %17 = arith.cmpf oge, %15, %16 : vector<256x128xf32>
      %cst_15 = arith.constant 2.000000e-01 : f32
      %18 = vector.broadcast %cst_15 : f32 to vector<256x128xf32>
      %19 = arith.mulf %18, %15 : vector<256x128xf32>
      %20 = arith.select %17, %15, %19 : vector<256x128xi1>, vector<256x128xf32>
      %21 = arith.truncf %20 : vector<256x128xf32> to vector<256x128xbf16>
      %c0_16 = arith.constant 0 : index
      %c0_17 = arith.constant 0 : index
      %22 = vector.load %arg6[%c0_16, %c0_17] : memref<256x128xbf16, #tpu.memory_space<vmem>>, vector<256x128xbf16>
      tpu.vector_store %arg6[%c0_16, %c0_17], %21 {strides = array<i32>} : memref<256x128xbf16, #tpu.memory_space<vmem>>, vector<256x128xbf16>,
    } else {
    }
    return
  }
  func.func @transform_0(%arg0: i32, %arg1: i32, %arg2: i32) -> (i32, i32) {
    %c0_i32 = arith.constant 0 : i32
    return %arg0, %arg2 : i32, i32
  }
  func.func @transform_1(%arg0: i32, %arg1: i32, %arg2: i32) -> (i32, i32) {
    %c0_i32 = arith.constant 0 : i32
    return %arg2, %arg1 : i32, i32
  }
  func.func @transform_2(%arg0: i32, %arg1: i32, %arg2: i32) -> (i32, i32) {
    %c0_i32 = arith.constant 0 : i32
    %c0_i32_0 = arith.constant 0 : i32
    return %c0_i32, %arg1 : i32, i32
  }
  func.func @transform_3(%arg0: i32, %arg1: i32, %arg2: i32) -> (i32, i32) {
    %c0_i32 = arith.constant 0 : i32
    return %arg0, %arg1 : i32, i32
  }
}

</mosaic_0001>

<bundles_post_ra>
// kernel: tpu_custom_call.1
= control target key start
LH: loop header
LB: loop body
LE: loop exit
PB: predicated region body
PF: predicated region fallthrough
CT: control target
= control target key end

     0   :  { %s1778_s0 = inlined_call_operand.hbm [shape: bf16[512,128], index: 0, kind: input, shape index: {}]   ;;  %s1779_s1 = inlined_call_operand.hbm [shape: bf16[128,128], index: 1, kind: input, shape index: {}]   ;;  %s1780_s2 = inlined_call_operand.vmem [shape: f32[1,128], index: 2, kind: input, shape index: {}]   ;;  %s1781_s3 = inlined_call_operand.hbm [shape: bf16[512,128], index: 3, kind: output, shape index: {}]  }
   0x1   :  { %1783 = sst [smem:[#allocation12_spill]] %s1779_s1 }
   0x2   :  { %8 = vsyncpa [#allocation4], 0 }
   0x3   :  { %10 = vsyncpa [#allocation4 + $0x1], 0 }
   0x4   :  { %11 = vsyncpa [#allocation7], 0 }
   0x5   :  { %12 = vsyncpa [#allocation5], 0 }
   0x6   :  { %14 = vsyncpa [#allocation5 + $0x1], 0  ;;  %s1545_s12 = smov 0   ;;  %s1547_s13 = smov 0  }
   0x7   :  { %s1549_s14 = smov 0   ;;  %s1551_s15 = smov 0  }
   0x8   :  { %s1553_s16 = smov 0   ;;  %s1555_s17 = smov 0  }
   0x9 LB: > { %s1035_s18 = sadd.s32 4294967295, %s1518_s17   ;;  %s1036_s19 = sadd.s32 4294967294, %s1518_s17   ;;  %s1518_s17 = sphi %s1555_s17, %s20_s17   ;;  %s1514_s16 = sphi %s1553_s16, %s1797_s16   ;;  %s1510_s15 = sphi %s1551_s15, %s1796_s15   ;;  %s1506_s14 = sphi %s1549_s14, %s1795_s14   ;;  %s1502_s13 = sphi %s1547_s13, %s1794_s13   ;;  %s1498_s12 = sphi %s1545_s12, %s1793_s12  }
   0xa   : > { %p61_p0 = scmp.ne.s32.totalorder %s1502_s13, %s1498_s12  ;;  %p1579_p1 = scmp.eq.s32.totalorder %s1035_s18, 0 }
   0xb   : > { %p1583_p2 = scmp.eq.s32.totalorder %s1035_s18, 1  ;;  %p147_p3 = scmp.eq.s32.totalorder %s1036_s19, 1 }
   0xc   : > { %p1589_p4 = por %p1579_p1, %p61_p0  ;;  %p1037_p5 = scmp.ge.s32.totalorder %s1518_s17, 1 }
   0xd   : > { %p1594_p6 = por %p147_p3, %p61_p0  ;;  %p154_p7 = scmp.lt.s32.totalorder %s1518_s17, 3 }
   0xe   : > { %s1788_s1 = sld [smem:[#allocation12_spill]]  ;;  %s1520_s28 = smov [#allocation6]  }
   0xf   : > { %p1602_p8 = pnand %p1037_p5, %p154_p7  ;;  %s171_s29 = sshll.u32 %s1520_s28, 4  ;;  %s172_s29 = int_to_ptr.vmem [resolvable:$true] %s171_s29 }
  0x10   : > { %p1040_p11 = scmp.ge.s32.totalorder %s1518_s17, 2  ;;  %s1782_s30 = smov 64  }
  0x11   : > { %p1302_p9 = pneg %p1602_p8  ;;  %s1522_s4 = smov 4  }
  0x12   : > { %s39_s5 = sadd.s32 1, %s1514_s16  ;;  %s48_s6 = sadd.s32 1, %s1506_s14 }
  0x13   : > { %p1303_p10 = pnand %p1302_p9, %p1579_p1  ;;  %p41_p12 = scmp.ge.s32.totalorder %s39_s5, 2 }
  0x14   : > { %s169_s26 = sshll.u32 %s1788_s1, 4  ;;  %p55_p13 = scmp.ne.s32.totalorder %s1506_s14, %s1502_s13  ;;  %s170_s26 = int_to_ptr.hbm [resolvable:$true] %s169_s26 }
  0x15   : > { %1305 = dma.hbm_to_vmem [thread:$0]  (!%p1303_p10), %s170_s26, 1024, %s172_s29, [#allocation7], %s1782_s30, %s1782_s30, %s1522_s4  }
  0x16   : > { %p56_p0 = scmp.eq.s32.totalorder %s1518_s17, 0  ;;  %s1799_s5 = smov (%p41_p12, %s39_s5), 0 }
  0x17   : > { %p1627_p5 = por %p1583_p2, %p55_p13  ;;  %s43_s9 = ssub.s32 %s1514_s16, %s1799_s5 }
  0x18   : > { %p1621_p3 = por %p56_p0, %p55_p13  ;;  %p1315_p7 = scmp.lt.s32.totalorder %s1518_s17, 2 }
  0x19   : > { %p46_p9 = scmp.eq.s32.totalorder %s43_s9, 0  ;;  %s191_s10 = sand.u32 1, %s1506_s14  }
  0x1a   : > { %s1041_s11 = sshll.u32 %s191_s10, 7  ;;  %s1149_s19 = sshll.u32 %s1514_s16, 7 }
  0x1b   : > { %s1636_s18 = scalar_select %p46_p9, %s1506_s14, %s48_s6  }
  0x1c   : > { %s201_s26 = scalar_lea.hbm %s1778_s0, %s1149_s19  ;;  %s195_s28 = scalar_lea.vmem [#allocation3], %s1041_s11 }
  0x1d   : > { %s204_s29 = sshll.u32 %s195_s28, 4  ;;  %s202_s21 = sshll.u32 %s201_s26, 4  ;;  %s205_s29 = int_to_ptr.vmem [resolvable:$true] %s204_s29  ;;  %s203_s21 = int_to_ptr.hbm [resolvable:$true] %s202_s21 }
  0x1e   : > { %p1307_p2 = pnand %p1315_p7, %p1621_p3  ;;  %s192_s30 = scalar_lea.sflag [#allocation4], %s191_s10 }
  0x1f   : > { %s1792_s1 = smov 64   ;;  %216 = sbr.rel (%p1602_p8) target bundleno = 272 (0x110), region = 32 }
  0x20   : > { %1309 = dma.hbm_to_vmem [thread:$0]  (!%p1307_p2), %s203_s21, 2048, %s205_s29, %s192_s30, %s1792_s1, %s1792_s1, %s1522_s4  }
  0x21   : > { %s1650_s6 = sand.u32 (!%p1602_p8), 1, %s1502_s13  }
  0x22   : > { %s1045_s9 = sshll.u32 (!%p1602_p8), %s1650_s6, 7  ;;  %s219_s11 = scalar_lea.sflag (!%p1602_p8), [#allocation4], %s1650_s6 }
  0x23   : > { %s1656_s7 = scalar_lea.vmem (!%p1602_p8), [#allocation3], %s1045_s9 }
  0x24   : > { %1485 = dma.done.wait (%p1589_p4), %s219_s11, 2048  }
  0x25   : > { %1487 = vsyncadd (%p1589_p4), %s219_s11, 4294965248 }
  0x26   : > { %1489 = dma.done.wait (%p1579_p1), [#allocation7], 1024  }
  0x27   : > { %1491 = vsyncadd (%p1579_p1), [#allocation7], 4294966272  ;;  %v1173_v0 = vld [vmem:[#allocation6 + $0x38] sm:$0xff]  ;;  %v1172_v1 = vld [vmem:[#allocation6 + $0x30] sm:$0xff]  ;;  %s1695_s22 = scalar_lea.vmem [#allocation8], %s1045_s9  ;;  %s1174_s27 = sshll.u32 %s1510_s15, 7 }
  0x28   : > { %520 = vmatpush.bf16.msra.mxu0 %v1173_v0  ;;  %1270 = vmatpush.bf16.msra.mxu1 %v1173_v0  ;;  %v1171_v2 = vld [vmem:[#allocation6 + $0x28] sm:$0xff]  ;;  %v1170_v3 = vld [vmem:[#allocation6 + $0x20] sm:$0xff]  ;;  %v1169_v4 = vld [vmem:[#allocation6 + $0x18] sm:$0xff]  ;;  %s917_s15 = scalar_lea.hbm %s1781_s3, %s1174_s27  ;;  %s918_s10 = sshll.u32 %s1695_s22, 4  ;;  %s919_s10 = int_to_ptr.vmem [resolvable:$true] %s918_s10 }
  0x29   : > { %1271 = vmatpush.bf16.msra.mxu2 %v1173_v0  ;;  %1272 = vmatpush.bf16.msra.mxu3 %v1173_v0  ;;  %v1168_v5 = vld [vmem:[#allocation6 + $0x10] sm:$0xff]  ;;  %v1167_v6 = vld [vmem:[#allocation6 + $0x8] sm:$0xff]  ;;  %v1166_v7 = vld [vmem:[#allocation6] sm:$0xff]  ;;  %s920_s19 = sshll.u32 %s917_s15, 4  ;;  %s905_s24 = scalar_lea.sflag [#allocation5], %s1650_s6  ;;  %s921_s19 = int_to_ptr.hbm [resolvable:$true] %s920_s19 }
  0x2a   : > { %v1150_v8 = vld [vmem:[%s1656_s7] sm:$0xff]  ;;  %v1151_v12 = vld [vmem:[%s1656_s7 + $0x8] sm:$0xff]  ;;  %v1152_v16 = vld [vmem:[%s1656_s7 + $0x10] sm:$0xff]  ;;  %s1446_s25 = sshra.s32 %s921_s19, 4  ;;  %s1452_s21 = scalar_lea.hbm %s1781_s3, 256  ;;  %s1447_s25 = int_to_ptr.hbm [resolvable:$true] %s1446_s25 }
  0x2b   : > { %v1154_v9 = vld [vmem:[%s1656_s7 + $0x20] sm:$0xff]  ;;  %v1155_v13 = vld [vmem:[%s1656_s7 + $0x28] sm:$0xff]  ;;  %v1156_v17 = vld [vmem:[%s1656_s7 + $0x30] sm:$0xff]  ;;  %s1448_s26 = scalar_lea.hbm %s1447_s25, 128  ;;  %p1453_p10 = scmp.lt.s32.totalorder %s1447_s25, %s1781_s3 }
  0x2c   : > { %521 = vmatpush.bf16.msra.mxu0 %v1172_v1  ;;  %1273 = vmatpush.bf16.msra.mxu1 %v1172_v1  ;;  %v1158_v10 = vld [vmem:[%s1656_s7 + $0x40] sm:$0xff]  ;;  %v1159_v14 = vld [vmem:[%s1656_s7 + $0x48] sm:$0xff]  ;;  %v1160_v18 = vld [vmem:[%s1656_s7 + $0x50] sm:$0xff]  ;;  %p1449_p1 = scmp.ne.s32.totalorder %s1447_s25, %s1448_s26  ;;  %p1454_p12 = scmp.lt.s32.totalorder %s1452_s21, %s1448_s26 }
  0x2d   : > { %1274 = vmatpush.bf16.msra.mxu2 %v1172_v1  ;;  %1275 = vmatpush.bf16.msra.mxu3 %v1172_v1  ;;  %v1162_v11 = vld [vmem:[%s1656_s7 + $0x60] sm:$0xff]  ;;  %v1163_v15 = vld [vmem:[%s1656_s7 + $0x68] sm:$0xff]  ;;  %v1164_v19 = vld [vmem:[%s1656_s7 + $0x70] sm:$0xff] }
  0x2e   : > { %v1153_v20 = vld [vmem:[%s1656_s7 + $0x18] sm:$0xff]  ;;  %v1685_v26 = vld [vmem:[%s1780_s2] ss:$0 sm:$0xff]  ;;  %p1450_p4 = pnand %p1449_p1, %p1627_p5  ;;  %p1455_p13 = por %p1454_p12, %p1453_p10 }
  0x2f   : > { %v1157_v21 = vld [vmem:[%s1656_s7 + $0x38] sm:$0xff] }
  0x30   : > { %522 = vmatpush.bf16.msra.mxu0 %v1171_v2  ;;  %1276 = vmatpush.bf16.msra.mxu1 %v1171_v2  ;;  %v1161_v22 = vld [vmem:[%s1656_s7 + $0x58] sm:$0xff]  ;;  %p1451_p8 = pneg %p1450_p4 }
  0x31   : > { %1277 = vmatpush.bf16.msra.mxu2 %v1171_v2  ;;  %1278 = vmatpush.bf16.msra.mxu3 %v1171_v2  ;;  %v1165_v23 = vld [vmem:[%s1656_s7 + $0x78] sm:$0xff] }
  0x32   : > { %p1456_p0 = pnand %p1455_p13, %p1451_p8 }
  0x34   : > { %523 = vmatpush.bf16.msra.mxu0 %v1170_v3  ;;  %1279 = vmatpush.bf16.msra.mxu1 %v1170_v3 }
  0x35   : > { %1280 = vmatpush.bf16.msra.mxu2 %v1170_v3  ;;  %1281 = vmatpush.bf16.msra.mxu3 %v1170_v3 }
  0x38   : > { %524 = vmatpush.bf16.msra.mxu0 %v1169_v4  ;;  %1282 = vmatpush.bf16.msra.mxu1 %v1169_v4 }
  0x39   : > { %1283 = vmatpush.bf16.msra.mxu2 %v1169_v4  ;;  %1284 = vmatpush.bf16.msra.mxu3 %v1169_v4 }
  0x3c   : > { %525 = vmatpush.bf16.msra.mxu0 %v1168_v5  ;;  %1285 = vmatpush.bf16.msra.mxu1 %v1168_v5 }
  0x3d   : > { %1286 = vmatpush.bf16.msra.mxu2 %v1168_v5  ;;  %1287 = vmatpush.bf16.msra.mxu3 %v1168_v5 }
  0x40   : > { %526 = vmatpush.bf16.msra.mxu0 %v1167_v6  ;;  %1288 = vmatpush.bf16.msra.mxu1 %v1167_v6 }
  0x41   : > { %1289 = vmatpush.bf16.msra.mxu2 %v1167_v6  ;;  %1290 = vmatpush.bf16.msra.mxu3 %v1167_v6 }
  0x44   : > { %527 = vmatpush.bf16.msra.mxu0 %v1166_v7  ;;  %1291 = vmatpush.bf16.msra.mxu1 %v1166_v7 }
  0x45   : > { %1292 = vmatpush.bf16.msra.mxu2 %v1166_v7  ;;  %1293 = vmatpush.bf16.msra.mxu3 %v1166_v7 }
  0x47   : > { %528 = vmatmul.bf16.vlgmr.msra.gmra.mxu0 %v1150_v8  ;;  %548 = vmatmul.bf16.vlgmr.msra.gmra.mxu1 %v1154_v9 }
  0x48   : > { %568 = vmatmul.bf16.vlgmr.msra.gmra.mxu2 %v1158_v10  ;;  %588 = vmatmul.bf16.vlgmr.msra.gmra.mxu3 %v1162_v11 }
  0x57   : > { %533 = vmatmul.bf16.gmra.mxu0 %v1151_v12  ;;  %553 = vmatmul.bf16.gmra.mxu1 %v1155_v13 }
  0x58   : > { %573 = vmatmul.bf16.gmra.mxu2 %v1159_v14  ;;  %593 = vmatmul.bf16.gmra.mxu3 %v1163_v15 }
  0x67   : > { %538 = vmatmul.bf16.gmra.mxu0 %v1152_v16  ;;  %558 = vmatmul.bf16.gmra.mxu1 %v1156_v17 }
  0x68   : > { %578 = vmatmul.bf16.gmra.mxu2 %v1160_v18  ;;  %598 = vmatmul.bf16.gmra.mxu3 %v1164_v19 }
  0x77   : > { %543 = vmatmul.bf16.gmra.mxu0 %v1153_v20  ;;  %563 = vmatmul.bf16.gmra.mxu1 %v1157_v21 }
  0x78   : > { %583 = vmatmul.bf16.gmra.mxu2 %v1161_v22  ;;  %603 = vmatmul.bf16.gmra.mxu3 %v1165_v23 }
  0xc4   : > { %v529_v24 = vpop.f32.mrf.mxu0  ;;  %v549_v25 = vpop.f32.mrf.mxu1 }
  0xc5   : > { %v712_v27 = vadd.f32 %v1685_v26, %v529_v24  ;;  %v720_v28 = vadd.f32 %v1685_v26, %v549_v25 }
  0xc7   : > { %v776_v33 = vmul.f32 0.2, %v712_v27  ;;  %v784_v34 = vmul.f32 0.2, %v720_v28  ;;  %vm744_vm0 = vcmp.ge.f32.partialorder %v712_v27, 0.0  ;;  %vm752_vm1 = vcmp.ge.f32.partialorder %v720_v28, 0.0 }
  0xc9   : > { %v808_v41 = vsel %vm744_vm0, %v712_v27, %v776_v33  ;;  %v816_v42 = vsel %vm752_vm1, %v720_v28, %v784_v34 }
  0xcb   : > { %v569_v29 = vpop.f32.mrf.mxu2  ;;  %v589_v30 = vpop.f32.mrf.mxu3 }
  0xcc   : > { %v531_v31 = vpop.f32.mrf.mxu0  ;;  %v551_v32 = vpop.f32.mrf.mxu1  ;;  %v728_v39 = vadd.f32 %v1685_v26, %v569_v29  ;;  %v736_v40 = vadd.f32 %v1685_v26, %v589_v30 }
  0xcd   : > { %v713_v35 = vadd.f32 %v1685_v26, %v531_v31  ;;  %v721_v36 = vadd.f32 %v1685_v26, %v551_v32 }
  0xce   : > { %v792_v49 = vmul.f32 0.2, %v728_v39  ;;  %v800_v50 = vmul.f32 0.2, %v736_v40  ;;  %vm760_vm4 = vcmp.ge.f32.partialorder %v728_v39, 0.0  ;;  %vm768_vm5 = vcmp.ge.f32.partialorder %v736_v40, 0.0 }
  0xcf   : > { %vm745_vm2 = vcmp.ge.f32.partialorder %v713_v35, 0.0  ;;  %v777_v37 = vmul.f32 0.2, %v713_v35  ;;  %vm753_vm3 = vcmp.ge.f32.partialorder %v721_v36, 0.0  ;;  %v785_v38 = vmul.f32 0.2, %v721_v36 }
  0xd0   : > { %v824_v57 = vsel %vm760_vm4, %v728_v39, %v792_v49  ;;  %v832_v58 = vsel %vm768_vm5, %v736_v40, %v800_v50 }
  0xd1   : > { %v809_v43 = vsel %vm745_vm2, %v713_v35, %v777_v37  ;;  %v817_v44 = vsel %vm753_vm3, %v721_v36, %v785_v38 }
  0xd2   : > { %v1178_v45 = vpack.c.bf16 %v809_v43, %v808_v41  ;;  %v1198_v46 = vpack.c.bf16 %v817_v44, %v816_v42 }
  0xd3   : > { %v571_v47 = vpop.f32.mrf.mxu2  ;;  %v591_v48 = vpop.f32.mrf.mxu3 }
  0xd4   : > { %1179 = vst [vmem:[%s1695_s22] sm:$0xff] %v1178_v45   ;;  %v729_v51 = vadd.f32 %v1685_v26, %v571_v47  ;;  %v737_v52 = vadd.f32 %v1685_v26, %v591_v48  ;;  %v534_v53 = vpop.f32.mrf.mxu0  ;;  %v554_v54 = vpop.f32.mrf.mxu1 }
  0xd5   : > { %1258 = vst [vmem:[%s1695_s22 + $0x20] sm:$0xff] %v1198_v46   ;;  %v714_v63 = vadd.f32 %v1685_v26, %v534_v53  ;;  %v722_v0 = vadd.f32 %v1685_v26, %v554_v54 }
  0xd6   : > { %vm761_vm6 = vcmp.ge.f32.partialorder %v729_v51, 0.0  ;;  %v793_v55 = vmul.f32 0.2, %v729_v51  ;;  %vm769_vm7 = vcmp.ge.f32.partialorder %v737_v52, 0.0  ;;  %v801_v56 = vmul.f32 0.2, %v737_v52 }
  0xd7   : > { %v778_v5 = vmul.f32 0.2, %v714_v63  ;;  %v786_v6 = vmul.f32 0.2, %v722_v0  ;;  %vm746_vm8 = vcmp.ge.f32.partialorder %v714_v63, 0.0  ;;  %vm754_vm9 = vcmp.ge.f32.partialorder %v722_v0, 0.0 }
  0xd8   : > { %v825_v59 = vsel %vm761_vm6, %v729_v51, %v793_v55  ;;  %v833_v60 = vsel %vm769_vm7, %v737_v52, %v801_v56 }
  0xd9   : > { %v1218_v61 = vpack.c.bf16 %v825_v59, %v824_v57  ;;  %v1238_v62 = vpack.c.bf16 %v833_v60, %v832_v58  ;;  %v810_v13 = vsel %vm746_vm8, %v714_v63, %v778_v5  ;;  %v818_v14 = vsel %vm754_vm9, %v722_v0, %v786_v6 }
  0xdb   : > { %1262 = vst [vmem:[%s1695_s22 + $0x40] sm:$0xff] %v1218_v61   ;;  %v574_v1 = vpop.f32.mrf.mxu2  ;;  %v594_v2 = vpop.f32.mrf.mxu3 }
  0xdc   : > { %1266 = vst [vmem:[%s1695_s22 + $0x60] sm:$0xff] %v1238_v62   ;;  %v536_v3 = vpop.f32.mrf.mxu0  ;;  %v556_v4 = vpop.f32.mrf.mxu1  ;;  %v730_v11 = vadd.f32 %v1685_v26, %v574_v1  ;;  %v738_v12 = vadd.f32 %v1685_v26, %v594_v2 }
  0xdd   : > { %v715_v7 = vadd.f32 %v1685_v26, %v536_v3  ;;  %v723_v8 = vadd.f32 %v1685_v26, %v556_v4 }
  0xde   : > { %v794_v21 = vmul.f32 0.2, %v730_v11  ;;  %v802_v22 = vmul.f32 0.2, %v738_v12  ;;  %vm762_vm12 = vcmp.ge.f32.partialorder %v730_v11, 0.0  ;;  %vm770_vm13 = vcmp.ge.f32.partialorder %v738_v12, 0.0 }
  0xdf   : > { %vm747_vm10 = vcmp.ge.f32.partialorder %v715_v7, 0.0  ;;  %v779_v9 = vmul.f32 0.2, %v715_v7  ;;  %vm755_vm11 = vcmp.ge.f32.partialorder %v723_v8, 0.0  ;;  %v787_v10 = vmul.f32 0.2, %v723_v8 }
  0xe0   : > { %v826_v30 = vsel %vm762_vm12, %v730_v11, %v794_v21  ;;  %v834_v31 = vsel %vm770_vm13, %v738_v12, %v802_v22 }
  0xe1   : > { %v811_v15 = vsel %vm747_vm10, %v715_v7, %v779_v9  ;;  %v819_v16 = vsel %vm755_vm11, %v723_v8, %v787_v10 }
  0xe2   : > { %v1183_v17 = vpack.c.bf16 %v811_v15, %v810_v13  ;;  %v1203_v18 = vpack.c.bf16 %v819_v16, %v818_v14 }
  0xe3   : > { %v576_v19 = vpop.f32.mrf.mxu2  ;;  %v596_v20 = vpop.f32.mrf.mxu3 }
  0xe4   : > { %1255 = vst [vmem:[%s1695_s22 + $0x8] sm:$0xff] %v1183_v17   ;;  %v731_v23 = vadd.f32 %v1685_v26, %v576_v19  ;;  %v739_v24 = vadd.f32 %v1685_v26, %v596_v20  ;;  %v539_v25 = vpop.f32.mrf.mxu0  ;;  %v559_v27 = vpop.f32.mrf.mxu1 }
  0xe5   : > { %1259 = vst [vmem:[%s1695_s22 + $0x28] sm:$0xff] %v1203_v18   ;;  %v716_v36 = vadd.f32 %v1685_v26, %v539_v25  ;;  %v724_v37 = vadd.f32 %v1685_v26, %v559_v27 }
  0xe6   : > { %vm763_vm14 = vcmp.ge.f32.partialorder %v731_v23, 0.0  ;;  %v795_v28 = vmul.f32 0.2, %v731_v23  ;;  %vm771_vm15 = vcmp.ge.f32.partialorder %v739_v24, 0.0  ;;  %v803_v29 = vmul.f32 0.2, %v739_v24 }
  0xe7   : > { %v780_v42 = vmul.f32 0.2, %v716_v36  ;;  %v788_v43 = vmul.f32 0.2, %v724_v37  ;;  %vm748_vm0 = vcmp.ge.f32.partialorder %v716_v36, 0.0  ;;  %vm756_vm1 = vcmp.ge.f32.partialorder %v724_v37, 0.0 }
  0xe8   : > { %v827_v32 = vsel %vm763_vm14, %v731_v23, %v795_v28  ;;  %v835_v33 = vsel %vm771_vm15, %v739_v24, %v803_v29 }
  0xe9   : > { %v1223_v34 = vpack.c.bf16 %v827_v32, %v826_v30  ;;  %v1243_v35 = vpack.c.bf16 %v835_v33, %v834_v31  ;;  %v812_v50 = vsel %vm748_vm0, %v716_v36, %v780_v42  ;;  %v820_v51 = vsel %vm756_vm1, %v724_v37, %v788_v43 }
  0xeb   : > { %1263 = vst [vmem:[%s1695_s22 + $0x48] sm:$0xff] %v1223_v34   ;;  %v579_v38 = vpop.f32.mrf.mxu2  ;;  %v599_v39 = vpop.f32.mrf.mxu3 }
  0xec   : > { %1267 = vst [vmem:[%s1695_s22 + $0x68] sm:$0xff] %v1243_v35   ;;  %v541_v40 = vpop.f32.mrf.mxu0  ;;  %v561_v41 = vpop.f32.mrf.mxu1  ;;  %v732_v48 = vadd.f32 %v1685_v26, %v579_v38  ;;  %v740_v49 = vadd.f32 %v1685_v26, %v599_v39 }
  0xed   : > { %v717_v44 = vadd.f32 %v1685_v26, %v541_v40  ;;  %v725_v45 = vadd.f32 %v1685_v26, %v561_v41 }
  0xee   : > { %v796_v58 = vmul.f32 0.2, %v732_v48  ;;  %v804_v59 = vmul.f32 0.2, %v740_v49  ;;  %vm764_vm4 = vcmp.ge.f32.partialorder %v732_v48, 0.0  ;;  %vm772_vm5 = vcmp.ge.f32.partialorder %v740_v49, 0.0 }
  0xef   : > { %vm749_vm2 = vcmp.ge.f32.partialorder %v717_v44, 0.0  ;;  %v781_v46 = vmul.f32 0.2, %v717_v44  ;;  %vm757_vm3 = vcmp.ge.f32.partialorder %v725_v45, 0.0  ;;  %v789_v47 = vmul.f32 0.2, %v725_v45 }
  0xf0   : > { %v828_v2 = vsel %vm764_vm4, %v732_v48, %v796_v58  ;;  %v836_v3 = vsel %vm772_vm5, %v740_v49, %v804_v59 }
  0xf1   : > { %v813_v52 = vsel %vm749_vm2, %v717_v44, %v781_v46  ;;  %v821_v53 = vsel %vm757_vm3, %v725_v45, %v789_v47 }
  0xf2   : > { %v1188_v54 = vpack.c.bf16 %v813_v52, %v812_v50  ;;  %v1208_v55 = vpack.c.bf16 %v821_v53, %v820_v51 }
  0xf3   : > { %v581_v56 = vpop.f32.mrf.mxu2  ;;  %v601_v57 = vpop.f32.mrf.mxu3 }
  0xf4   : > { %1256 = vst [vmem:[%s1695_s22 + $0x10] sm:$0xff] %v1188_v54   ;;  %v733_v60 = vadd.f32 %v1685_v26, %v581_v56  ;;  %v741_v61 = vadd.f32 %v1685_v26, %v601_v57  ;;  %v544_v62 = vpop.f32.mrf.mxu0  ;;  %v564_v63 = vpop.f32.mrf.mxu1 }
  0xf5   : > { %1260 = vst [vmem:[%s1695_s22 + $0x30] sm:$0xff] %v1208_v55   ;;  %v718_v8 = vadd.f32 %v1685_v26, %v544_v62  ;;  %v726_v9 = vadd.f32 %v1685_v26, %v564_v63 }
  0xf6   : > { %vm765_vm6 = vcmp.ge.f32.partialorder %v733_v60, 0.0  ;;  %v797_v0 = vmul.f32 0.2, %v733_v60  ;;  %vm773_vm7 = vcmp.ge.f32.partialorder %v741_v61, 0.0  ;;  %v805_v1 = vmul.f32 0.2, %v741_v61 }
  0xf7   : > { %v782_v14 = vmul.f32 0.2, %v718_v8  ;;  %v790_v15 = vmul.f32 0.2, %v726_v9  ;;  %vm750_vm8 = vcmp.ge.f32.partialorder %v718_v8, 0.0  ;;  %vm758_vm9 = vcmp.ge.f32.partialorder %v726_v9, 0.0 }
  0xf8   : > { %v829_v4 = vsel %vm765_vm6, %v733_v60, %v797_v0  ;;  %v837_v5 = vsel %vm773_vm7, %v741_v61, %v805_v1 }
  0xf9   : > { %v1228_v6 = vpack.c.bf16 %v829_v4, %v828_v2  ;;  %v1248_v7 = vpack.c.bf16 %v837_v5, %v836_v3  ;;  %v814_v22 = vsel %vm750_vm8, %v718_v8, %v782_v14  ;;  %v822_v23 = vsel %vm758_vm9, %v726_v9, %v790_v15 }
  0xfb   : > { %1264 = vst [vmem:[%s1695_s22 + $0x50] sm:$0xff] %v1228_v6   ;;  %v584_v10 = vpop.f32.mrf.mxu2  ;;  %v604_v11 = vpop.f32.mrf.mxu3 }
  0xfc   : > { %1268 = vst [vmem:[%s1695_s22 + $0x70] sm:$0xff] %v1248_v7   ;;  %v546_v12 = vpop.f32.mrf.mxu0  ;;  %v566_v13 = vpop.f32.mrf.mxu1  ;;  %v734_v20 = vadd.f32 %v1685_v26, %v584_v10  ;;  %v742_v21 = vadd.f32 %v1685_v26, %v604_v11 }
  0xfd   : > { %v719_v16 = vadd.f32 %v1685_v26, %v546_v12  ;;  %v727_v17 = vadd.f32 %v1685_v26, %v566_v13 }
  0xfe   : > { %v798_v31 = vmul.f32 0.2, %v734_v20  ;;  %v806_v32 = vmul.f32 0.2, %v742_v21  ;;  %vm766_vm12 = vcmp.ge.f32.partialorder %v734_v20, 0.0  ;;  %vm774_vm13 = vcmp.ge.f32.partialorder %v742_v21, 0.0 }
  0xff   : > { %vm751_vm10 = vcmp.ge.f32.partialorder %v719_v16, 0.0  ;;  %v783_v18 = vmul.f32 0.2, %v719_v16  ;;  %vm759_vm11 = vcmp.ge.f32.partialorder %v727_v17, 0.0  ;;  %v791_v19 = vmul.f32 0.2, %v727_v17 }
 0x100   : > { %v830_v37 = vsel %vm766_vm12, %v734_v20, %v798_v31  ;;  %v838_v38 = vsel %vm774_vm13, %v742_v21, %v806_v32 }
 0x101   : > { %v815_v24 = vsel %vm751_vm10, %v719_v16, %v783_v18  ;;  %v823_v25 = vsel %vm759_vm11, %v727_v17, %v791_v19 }
 0x102   : > { %v1193_v27 = vpack.c.bf16 %v815_v24, %v814_v22  ;;  %v1213_v28 = vpack.c.bf16 %v823_v25, %v822_v23 }
 0x103   : > { %v586_v29 = vpop.f32.mrf.mxu2  ;;  %v606_v30 = vpop.f32.mrf.mxu3 }
 0x104   : > { %1257 = vst [vmem:[%s1695_s22 + $0x18] sm:$0xff] %v1193_v27   ;;  %v735_v33 = vadd.f32 %v1685_v26, %v586_v29  ;;  %v743_v34 = vadd.f32 %v1685_v26, %v606_v30 }
 0x105   : > { %1261 = vst [vmem:[%s1695_s22 + $0x38] sm:$0xff] %v1213_v28  }
 0x106   : > { %vm767_vm14 = vcmp.ge.f32.partialorder %v735_v33, 0.0  ;;  %v799_v35 = vmul.f32 0.2, %v735_v33  ;;  %vm775_vm15 = vcmp.ge.f32.partialorder %v743_v34, 0.0  ;;  %v807_v36 = vmul.f32 0.2, %v743_v34 }
 0x108   : > { %v831_v39 = vsel %vm767_vm14, %v735_v33, %v799_v35  ;;  %v839_v40 = vsel %vm775_vm15, %v743_v34, %v807_v36 }
 0x109   : > { %v1233_v41 = vpack.c.bf16 %v831_v39, %v830_v37  ;;  %v1253_v42 = vpack.c.bf16 %v839_v40, %v838_v38 }
 0x10b   : > { %1265 = vst [vmem:[%s1695_s22 + $0x58] sm:$0xff] %v1233_v41  }
 0x10c   : > { %1269 = vst [vmem:[%s1695_s22 + $0x78] sm:$0xff] %v1253_v42  }
 0x10d   : > { %1459 = shalt.err (!%p1456_p0)
}
 0x10e   : > { %s1523_s6 = smov 64   ;;  %s1524_s7 = smov 4  }
 0x10f   : > { %1300 = dma.vmem_to_hbm [thread:$0]  (%p1627_p5), %s919_s10, 2048, %s921_s19, %s905_s24, %s1523_s6, %s1523_s6, %s1524_s7  }
 0x110 PF: > { %s935_s1 = sand.u32 1, %s1498_s12   ;;  %p1311_p3 = pnand %p1040_p11, %p1594_p6 }
 0x111   : > { %s936_s20 = scalar_lea.sflag [#allocation5], %s935_s1 }
 0x112   : > { %p1312_p7 = pneg %p1311_p3 }
 0x114   : > { %1493 = dma.done.wait (%p1312_p7), %s936_s20, 2048  }
 0x115   : > { %1495 = vsyncadd (%p1312_p7), %s936_s20, 4294965248  ;;  %s20_s17 = sadd.s32 1, %s1518_s17   ;;  %s1793_s12 = smov %s1502_s13 }
 0x116   : > { %p17_p9 = scmp.ge.s32.totalorder %s20_s17, 4   ;;  %s1794_s13 = smov %s1506_s14 }
 0x117   : > { %s1795_s14 = smov %s1636_s18  ;;  %s1796_s15 = smov %s1514_s16 }
 0x118   : > { %s1797_s16 = smov %s1799_s5  ;;  %19 = sbr.rel (!%p17_p9) target bundleno = 9 (0x9), region = 93 }
 0x11d   :  { %942 = vsyncpa [#allocation4], 1 }
 0x11e   :  { %944 = vsyncpa [#allocation4 + $0x1], 1 }
 0x11f   :  { %945 = vsyncpa [#allocation7], 1 }
 0x120   :  { %946 = vsyncpa [#allocation5], 1 }
 0x121   :  { %948 = vsyncpa [#allocation5 + $0x1], 1 }

</bundles_post_ra>
